<compile_context>
chip_gen: v5e
topology: v5e:2x2
jax: 0.10.0
libtpu: 0.0.40
codegen_flags: <defaults>
</compile_context>

<pallas_src>
import functools

import jax
import jax.numpy as jnp
from jax.experimental import pallas as pl
from jax.experimental.pallas import tpu as pltpu

LANE = 128            # lane-dense padding target for every kernel output
CONV1_OUT = 6
CONV2_OUT = 16
FC_IN = CONV2_OUT * 4 * 4   # 256, matches torch's x.view(-1, 16*4*4)


# ----------------------------------------------------------------------------
# Pallas kernels
# ----------------------------------------------------------------------------
def _conv_matmul_kernel(x_ref, w_ref, b_ref, o_ref):
    """im2col-conv tile: (tm, K) @ (K, 128) + bias, fused relu."""
    y = jnp.dot(x_ref[...], w_ref[...], preferred_element_type=jnp.float32)
    o_ref[...] = jnp.maximum(y + b_ref[...], 0.0)


def _fc_heads_kernel(x_ref, w1_ref, b1_ref, w2_ref, b2_ref,
                     wh_ref, bh_ref, p_ref, o_ref, *, softmax):
    """Fused fc1 -> relu -> fc2 -> relu -> packed heads (+ per-head softmax).

    All weight matrices are zero-padded to 128 lanes; padded rows of the next
    layer's weight are zero so padding never leaks into valid outputs.
    p_ref is the same-head indicator matrix: exp(logits) @ P gives each
    column's softmax denominator (per head segment).
    """
    h = jnp.dot(x_ref[...], w1_ref[...], preferred_element_type=jnp.float32)
    h = jnp.maximum(h + b1_ref[...], 0.0)
    h = jnp.dot(h, w2_ref[...], preferred_element_type=jnp.float32)
    h = jnp.maximum(h + b2_ref[...], 0.0)
    y = jnp.dot(h, wh_ref[...], preferred_element_type=jnp.float32) + bh_ref[...]
    if softmax:
        # Subtracting the row-global max is softmax-invariant within each head
        # segment and keeps exp() bounded.
        y = y - jnp.max(y, axis=-1, keepdims=True)
        e = jnp.exp(y)
        denom = jnp.dot(e, p_ref[...], preferred_element_type=jnp.float32)
        y = e / jnp.where(denom > 0.0, denom, 1.0)   # pad cols discarded later
    o_ref[...] = y


# ----------------------------------------------------------------------------
# Pallas wrappers
# ----------------------------------------------------------------------------
def conv_matmul_relu(x, w, b2d):
    """x:(M,K) @ w:(K,128) + b:(1,128), relu.  Parallel grid over M."""
    M, K = x.shape
    Kw, Np = w.shape
    assert K == Kw and Np % LANE == 0
    tm = LANE if M % LANE == 0 else M
    grid = (M // tm,)
    return pl.pallas_call(
        _conv_matmul_kernel,
        grid=grid,
        out_shape=jax.ShapeDtypeStruct((M, Np), jnp.float32),
        in_specs=[
            pl.BlockSpec((tm, K), lambda i: (i, 0)),
            pl.BlockSpec((K, Np), lambda i: (0, 0)),
            pl.BlockSpec((1, Np), lambda i: (0, 0)),
        ],
        out_specs=pl.BlockSpec((tm, Np), lambda i: (i, 0)),
        compiler_params=pltpu.CompilerParams(
            dimension_semantics=("parallel",)),
    )(x, w, b2d)


def fc_heads_fused(x, packed, *, softmax):
    """One pallas_call for the whole FC stack + packed heads."""
    M, K = x.shape
    full = lambda i: (0, 0)
    return pl.pallas_call(
        functools.partial(_fc_heads_kernel, softmax=softmax),
        grid=(1,),
        out_shape=jax.ShapeDtypeStruct((M, LANE), jnp.float32),
        in_specs=[
            pl.BlockSpec((M, K), full),
            pl.BlockSpec((K, LANE), full),
            pl.BlockSpec((1, LANE), full),
            pl.BlockSpec((LANE, LANE), full),
            pl.BlockSpec((1, LANE), full),
            pl.BlockSpec((LANE, LANE), full),
            pl.BlockSpec((1, LANE), full),
            pl.BlockSpec((LANE, LANE), full),
        ],
        out_specs=pl.BlockSpec((M, LANE), full),
        compiler_params=pltpu.CompilerParams(
            dimension_semantics=("arbitrary",)),
    )(x, packed["w1"], packed["b1"], packed["w2"], packed["b2"],
      packed["wh"], packed["bh"], packed["p"])


# ----------------------------------------------------------------------------
# JAX glue (channels-last, no Pallas needed)
# ----------------------------------------------------------------------------
def _im2col_nhwc(x, kh, kw):
    """NHWC -> (N*OH*OW, kh*kw*C) patches, column order (kh, kw, c)."""
    N, H, W, C = x.shape
    OH, OW = H - kh + 1, W - kw + 1
    cols = [x[:, i:i + OH, j:j + OW, :] for i in range(kh) for j in range(kw)]
    p = jnp.concatenate(cols, axis=-1)
    return p.reshape(N * OH * OW, kh * kw * C), (N, OH, OW)


def _maxpool2_nhwc(x):
    """2x2 / stride-2 max pool on NHWC, plain XLA reshape+max."""
    N, H, W, C = x.shape
    return x.reshape(N, H // 2, 2, W // 2, 2, C).max(axis=(2, 4))


# ----------------------------------------------------------------------------
# One-time parameter repacking (PyTorch layouts -> lane-dense padded matrices)
# ----------------------------------------------------------------------------
def pack_params(params):
    def pad2(a, rows, cols):
        a = jnp.asarray(a, jnp.float32)
        return jnp.zeros((rows, cols), jnp.float32).at[:a.shape[0], :a.shape[1]].set(a)

    def pad_bias(b):
        b = jnp.asarray(b, jnp.float32)
        return jnp.zeros((1, LANE), jnp.float32).at[0, :b.shape[0]].set(b)

    def conv_wmat(w):
        # torch (outC, C, KH, KW) -> (KH*KW*C, outC), matching the NHWC im2col
        # column order (kh, kw, c); pad outC to 128 lanes.
        outC, C, KH, KW = w.shape
        wm = jnp.transpose(w, (2, 3, 1, 0)).reshape(KH * KW * C, outC)
        return pad2(wm, KH * KW * C, LANE)

    # fc1: torch (120, 256) expects NCHW-flattened (c, h, w) inputs; our
    # activations are flattened NHWC (h, w, c) -> permute the weight columns
    # here, once, instead of transposing activations every forward.
    f1 = params["fc1_w"].reshape(120, CONV2_OUT, 4, 4).transpose(0, 2, 3, 1)
    f1 = f1.reshape(120, FC_IN).T                              # (256, 120)

    head_ws = [hw for hw, _ in params["heads"]]
    head_bs = [hb for _, hb in params["heads"]]
    head_sizes = tuple(int(hw.shape[0]) for hw in head_ws)
    total = sum(head_sizes)
    assert total <= LANE, "packed heads must fit one 128-lane tile"
    wh = jnp.concatenate([hw.T for hw in head_ws], axis=1)     # (84, total)
    bh = jnp.concatenate(head_bs)                              # (total,)

    # Same-head indicator matrix for per-segment softmax denominators.
    p = jnp.zeros((LANE, LANE), jnp.float32)
    off = 0
    for s in head_sizes:
        p = p.at[off:off + s, off:off + s].set(1.0)
        off += s

    packed = {
        "c1w": conv_wmat(params["conv1_w"]), "c1b": pad_bias(params["conv1_b"]),
        "c2w": conv_wmat(params["conv2_w"]), "c2b": pad_bias(params["conv2_b"]),
        "w1": pad2(f1, FC_IN, LANE),         "b1": pad_bias(params["fc1_b"]),
        "w2": pad2(params["fc2_w"].T, LANE, LANE), "b2": pad_bias(params["fc2_b"]),
        "wh": pad2(wh, LANE, LANE),          "bh": pad_bias(bh),
        "p": p,
    }
    return packed, head_sizes


# ----------------------------------------------------------------------------
# MultiHead forward (Pallas) + pure-JAX reference
# ----------------------------------------------------------------------------
@functools.partial(jax.jit, static_argnames=("head_sizes", "training", "benchmark"))
def multihead_forward(img, packed, *, head_sizes, training=False,
                      benchmark="SplitMNIST"):
    """img: (N, 1, 28, 28) float32 NCHW (PyTorch layout)."""
    total = sum(head_sizes)
    x = jnp.transpose(img, (0, 2, 3, 1))                    # NCHW -> NHWC, once

    # conv1 (1->6, 5x5) + relu, then 2x2 pool
    cols, (n, oh, ow) = _im2col_nhwc(x, 5, 5)
    x = conv_matmul_relu(cols, packed["c1w"], packed["c1b"]).reshape(n, oh, ow, LANE)
    x = _maxpool2_nhwc(x)[..., :CONV1_OUT]

    # conv2 (6->16, 5x5) + relu, then 2x2 pool
    cols, (n, oh, ow) = _im2col_nhwc(x, 5, 5)
    x = conv_matmul_relu(cols, packed["c2w"], packed["c2b"]).reshape(n, oh, ow, LANE)
    x = _maxpool2_nhwc(x)[..., :CONV2_OUT]

    # flatten in NHWC order (fc1 weight columns were pre-permuted to match
    # torch's NCHW view(-1, 256))
    x = x.reshape(n, FC_IN)

    if training:                                            # last head, raw logits
        logits = fc_heads_fused(x, packed, softmax=False)
        last = head_sizes[-1]
        return logits[:, total - last:total]

    probs = fc_heads_fused(x, packed, softmax=True)[:, :total]
    if benchmark == "SplitMNIST":                           # concat of per-head softmax
        return probs
    # PermutedMNIST: average of the per-head softmax outputs.
    nc = head_sizes[0]
    assert all(s == nc for s in head_sizes)
    return probs.reshape(n, len(head_sizes), nc).mean(axis=1)


def reference_forward(img, params, training=False, benchmark="SplitMNIST"):
    hp = jax.lax.Precision.HIGHEST

    def conv(x, w, b):
        y = jax.lax.conv_general_dilated(
            x, w, window_strides=(1, 1), padding="VALID",
            dimension_numbers=("NCHW", "OIHW", "NCHW"), precision=hp)
        return y + b[None, :, None, None]

    def pool(x):
        N, C, H, W = x.shape
        return x.reshape(N, C, H // 2, 2, W // 2, 2).max(axis=(3, 5))

    def linear(x, w, b):
        return jnp.dot(x, w.T, precision=hp) + b

    x = pool(jax.nn.relu(conv(img, params["conv1_w"], params["conv1_b"])))
    x = pool(jax.nn.relu(conv(x, params["conv2_w"], params["conv2_b"])))
    x = x.reshape(x.shape[0], -1)
    x = jax.nn.relu(linear(x, params["fc1_w"], params["fc1_b"]))
    x = jax.nn.relu(linear(x, params["fc2_w"], params["fc2_b"]))
    if training:
        hw, hb = params["heads"][-1]
        return linear(x, hw, hb)
    outs = [jax.nn.softmax(linear(x, hw, hb), axis=1) for hw, hb in params["heads"]]
    if benchmark == "SplitMNIST":
        return jnp.concatenate(outs, axis=1)
    return sum(outs) / len(outs)


# ----------------------------------------------------------------------------
# Deterministic parameter init (shapes from the module __init__ / LeNet)
# ----------------------------------------------------------------------------
def init_params(key, num_heads=3, classes_per_head=2):
    ks = jax.random.split(key, 10)

    def w(k, shape, scale):
        return (scale * jax.random.normal(k, shape)).astype(jnp.float32)

    heads = []
    for h in range(num_heads):               # MultiHead.add_head(num_classes)
        heads.append((w(jax.random.fold_in(ks[8], h), (classes_per_head, 84), 0.1),
                      w(jax.random.fold_in(ks[9], h), (classes_per_head,), 0.1)))
    return {
        "conv1_w": w(ks[0], (6, 1, 5, 5), 0.2),
        "conv1_b": w(ks[1], (6,), 0.1),
        "conv2_w": w(ks[2], (16, 6, 5, 5), 0.1),
        "conv2_b": w(ks[3], (16,), 0.1),
        "fc1_w": w(ks[4], (120, 256), 0.05),   # torch nn.Linear: (out, in)
        "fc1_b": w(ks[5], (120,), 0.05),
        "fc2_w": w(ks[6], (84, 120), 0.05),
        "fc2_b": w(ks[7], (84,), 0.05),
        "heads": heads,
    }


if __name__ == "__main__":
    key = jax.random.PRNGKey(0)
    pkey, xkey = jax.random.split(key)
    params = init_params(pkey, num_heads=3, classes_per_head=2)
    packed, head_sizes = pack_params(params)

    # SplitMNIST-style input: batch=2, 1 channel, 28x28.
    img = jax.random.normal(xkey, (2, 1, 28, 28), dtype=jnp.float32)

    # --- inference path (self.training == False), benchmark='SplitMNIST' ---
    out = multihead_forward(img, packed, head_sizes=head_sizes,
                            training=False, benchmark="SplitMNIST")
    out = jax.block_until_ready(out)
    ref = reference_forward(img, params, training=False, benchmark="SplitMNIST")
    assert out.shape == ref.shape == (2, 6), out.shape
    err = float(jnp.max(jnp.abs(out - ref)))
    # 1e-2 covers XLA-vs-Mosaic default f32 matmul precision differences while
    # still catching any layout / head-packing bug (those would be O(1)).
    assert err < 1e-2, err
    # Tight structural check: each head's softmax segment must sum to 1.
    head_sums = out.reshape(2, len(head_sizes), head_sizes[0]).sum(axis=-1)
    assert float(jnp.max(jnp.abs(head_sums - 1.0))) < 1e-4
    assert float(jnp.min(out)) >= 0.0 and float(jnp.max(out)) <= 1.0 + 1e-6

    # --- training path (last head only, raw logits) ---
    out_tr = jax.block_until_ready(
        multihead_forward(img, packed, head_sizes=head_sizes, training=True))
    ref_tr = reference_forward(img, params, training=True)
    assert out_tr.shape == (2, 2), out_tr.shape
    assert float(jnp.max(jnp.abs(out_tr - ref_tr))) < 3e-2

    # --- PermutedMNIST inference path (averaged per-head softmax) ---
    out_pm = jax.block_until_ready(
        multihead_forward(img, packed, head_sizes=head_sizes,
                          training=False, benchmark="PermutedMNIST"))
    ref_pm = reference_forward(img, params, training=False,
                               benchmark="PermutedMNIST")
    assert out_pm.shape == (2, 2), out_pm.shape
    assert float(jnp.max(jnp.abs(out_pm - ref_pm))) < 1e-2

    print("KERNEL_OK")
</pallas_src>

<mosaic_0001>
module attributes {stable_mosaic.version = 11 : i64} {
  func.func @_conv_matmul_kernel(%arg0: i32, %arg1: memref<128x25xf32, #tpu.memory_space<vmem>>, %arg2: memref<25x128xf32, #tpu.memory_space<vmem>>, %arg3: memref<1x128xf32, #tpu.memory_space<vmem>>, %arg4: memref<128x128xf32, #tpu.memory_space<vmem>>) attributes {dimension_semantics = [#tpu.dimension_semantics<parallel>], iteration_bounds = array<i64: 9>, scalar_prefetch = 0 : i64, scratch_operands = 0 : i64, tpu.core_type = #tpu.core_type<tc>, window_params = [{transform_indices = @transform_0, window_bounds = array<i64: 128, 25>}, {pipeline_mode = #tpu.pipeline_mode<synchronous>, transform_indices = @transform_1, window_bounds = array<i64: 25, 128>}, {pipeline_mode = #tpu.pipeline_mode<synchronous>, transform_indices = @transform_2, window_bounds = array<i64: 1, 128>}, {transform_indices = @transform_3, window_bounds = array<i64: 128, 128>}]} {
    %c0 = arith.constant 0 : index
    %c0_0 = arith.constant 0 : index
    %0 = vector.load %arg1[%c0, %c0_0] : memref<128x25xf32, #tpu.memory_space<vmem>>, vector<128x25xf32>
    %c0_1 = arith.constant 0 : index
    %c0_2 = arith.constant 0 : index
    %1 = vector.load %arg2[%c0_1, %c0_2] : memref<25x128xf32, #tpu.memory_space<vmem>>, vector<25x128xf32>
    %cst = arith.constant dense<0.000000e+00> : vector<128x128xf32>
    %2 = tpu.matmul %0, %1, %cst {dimension_numbers = #tpu.dot_dimension_numbers<[1], [0], [0], [1], [0, 0, 1, 1], [], []>} : vector<128x25xf32>, vector<25x128xf32>, vector<128x128xf32> -> vector<128x128xf32>
    %c0_3 = arith.constant 0 : index
    %c0_4 = arith.constant 0 : index
    %3 = vector.load %arg3[%c0_3, %c0_4] : memref<1x128xf32, #tpu.memory_space<vmem>>, vector<1x128xf32>
    %4 = vector.broadcast %3 : vector<1x128xf32> to vector<128x128xf32>
    %5 = arith.addf %2, %4 : vector<128x128xf32>
    %cst_5 = arith.constant 0.000000e+00 : f32
    %6 = vector.broadcast %cst_5 : f32 to vector<128x128xf32>
    %7 = arith.maximumf %5, %6 : vector<128x128xf32>
    %c0_6 = arith.constant 0 : index
    %c0_7 = arith.constant 0 : index
    %8 = vector.load %arg4[%c0_6, %c0_7] : memref<128x128xf32, #tpu.memory_space<vmem>>, vector<128x128xf32>
    tpu.vector_store %arg4[%c0_6, %c0_7], %7 {strides = array<i32>} : memref<128x128xf32, #tpu.memory_space<vmem>>, vector<128x128xf32>,
    return
  }
  func.func @transform_0(%arg0: i32) -> (i32, i32) {
    %c0_i32 = arith.constant 0 : i32
    %c0_i32_0 = arith.constant 0 : i32
    return %arg0, %c0_i32 : i32, i32
  }
  func.func @transform_1(%arg0: i32) -> (i32, i32) {
    %c0_i32 = arith.constant 0 : i32
    %c0_i32_0 = arith.constant 0 : i32
    %c0_i32_1 = arith.constant 0 : i32
    return %c0_i32, %c0_i32_0 : i32, i32
  }
  func.func @transform_2(%arg0: i32) -> (i32, i32) {
    %c0_i32 = arith.constant 0 : i32
    %c0_i32_0 = arith.constant 0 : i32
    %c0_i32_1 = arith.constant 0 : i32
    return %c0_i32, %c0_i32_0 : i32, i32
  }
  func.func @transform_3(%arg0: i32) -> (i32, i32) {
    %c0_i32 = arith.constant 0 : i32
    %c0_i32_0 = arith.constant 0 : i32
    return %arg0, %c0_i32 : i32, i32
  }
}

module attributes {stable_mosaic.version = 11 : i64} {
  func.func @_conv_matmul_kernel(%arg0: i32, %arg1: memref<128x150xf32, #tpu.memory_space<vmem>>, %arg2: memref<150x128xf32, #tpu.memory_space<vmem>>, %arg3: memref<1x128xf32, #tpu.memory_space<vmem>>, %arg4: memref<128x128xf32, #tpu.memory_space<vmem>>) attributes {dimension_semantics = [#tpu.dimension_semantics<parallel>], iteration_bounds = array<i64: 1>, scalar_prefetch = 0 : i64, scratch_operands = 0 : i64, tpu.core_type = #tpu.core_type<tc>, window_params = [{transform_indices = @transform_0, window_bounds = array<i64: 128, 150>}, {pipeline_mode = #tpu.pipeline_mode<synchronous>, transform_indices = @transform_1, window_bounds = array<i64: 150, 128>}, {pipeline_mode = #tpu.pipeline_mode<synchronous>, transform_indices = @transform_2, window_bounds = array<i64: 1, 128>}, {transform_indices = @transform_3, window_bounds = array<i64: 128, 128>}]} {
    %c0 = arith.constant 0 : index
    %c0_0 = arith.constant 0 : index
    %0 = vector.load %arg1[%c0, %c0_0] : memref<128x150xf32, #tpu.memory_space<vmem>>, vector<128x150xf32>
    %c0_1 = arith.constant 0 : index
    %c0_2 = arith.constant 0 : index
    %1 = vector.load %arg2[%c0_1, %c0_2] : memref<150x128xf32, #tpu.memory_space<vmem>>, vector<150x128xf32>
    %cst = arith.constant dense<0.000000e+00> : vector<128x128xf32>
    %2 = tpu.matmul %0, %1, %cst {dimension_numbers = #tpu.dot_dimension_numbers<[1], [0], [0], [1], [0, 0, 1, 1], [], []>} : vector<128x150xf32>, vector<150x128xf32>, vector<128x128xf32> -> vector<128x128xf32>
    %c0_3 = arith.constant 0 : index
    %c0_4 = arith.constant 0 : index
    %3 = vector.load %arg3[%c0_3, %c0_4] : memref<1x128xf32, #tpu.memory_space<vmem>>, vector<1x128xf32>
    %4 = vector.broadcast %3 : vector<1x128xf32> to vector<128x128xf32>
    %5 = arith.addf %2, %4 : vector<128x128xf32>
    %cst_5 = arith.constant 0.000000e+00 : f32
    %6 = vector.broadcast %cst_5 : f32 to vector<128x128xf32>
    %7 = arith.maximumf %5, %6 : vector<128x128xf32>
    %c0_6 = arith.constant 0 : index
    %c0_7 = arith.constant 0 : index
    %8 = vector.load %arg4[%c0_6, %c0_7] : memref<128x128xf32, #tpu.memory_space<vmem>>, vector<128x128xf32>
    tpu.vector_store %arg4[%c0_6, %c0_7], %7 {strides = array<i32>} : memref<128x128xf32, #tpu.memory_space<vmem>>, vector<128x128xf32>,
    return
  }
  func.func @transform_0(%arg0: i32) -> (i32, i32) {
    %c0_i32 = arith.constant 0 : i32
    %c0_i32_0 = arith.constant 0 : i32
    return %arg0, %c0_i32 : i32, i32
  }
  func.func @transform_1(%arg0: i32) -> (i32, i32) {
    %c0_i32 = arith.constant 0 : i32
    %c0_i32_0 = arith.constant 0 : i32
    %c0_i32_1 = arith.constant 0 : i32
    return %c0_i32, %c0_i32_0 : i32, i32
  }
  func.func @transform_2(%arg0: i32) -> (i32, i32) {
    %c0_i32 = arith.constant 0 : i32
    %c0_i32_0 = arith.constant 0 : i32
    %c0_i32_1 = arith.constant 0 : i32
    return %c0_i32, %c0_i32_0 : i32, i32
  }
  func.func @transform_3(%arg0: i32) -> (i32, i32) {
    %c0_i32 = arith.constant 0 : i32
    %c0_i32_0 = arith.constant 0 : i32
    return %arg0, %c0_i32 : i32, i32
  }
}

module attributes {stable_mosaic.version = 11 : i64} {
  func.func @_fc_heads_kernel(%arg0: i32, %arg1: memref<2x256xf32, #tpu.memory_space<vmem>>, %arg2: memref<256x128xf32, #tpu.memory_space<vmem>>, %arg3: memref<1x128xf32, #tpu.memory_space<vmem>>, %arg4: memref<128x128xf32, #tpu.memory_space<vmem>>, %arg5: memref<1x128xf32, #tpu.memory_space<vmem>>, %arg6: memref<128x128xf32, #tpu.memory_space<vmem>>, %arg7: memref<1x128xf32, #tpu.memory_space<vmem>>, %arg8: memref<128x128xf32, #tpu.memory_space<vmem>>, %arg9: memref<2x128xf32, #tpu.memory_space<vmem>>) attributes {dimension_semantics = [#tpu.dimension_semantics<arbitrary>], iteration_bounds = array<i64: 1>, scalar_prefetch = 0 : i64, scratch_operands = 0 : i64, tpu.core_type = #tpu.core_type<tc>, window_params = [{pipeline_mode = #tpu.pipeline_mode<synchronous>, transform_indices = @transform_0, window_bounds = array<i64: 2, 256>}, {pipeline_mode = #tpu.pipeline_mode<synchronous>, transform_indices = @transform_1, window_bounds = array<i64: 256, 128>}, {pipeline_mode = #tpu.pipeline_mode<synchronous>, transform_indices = @transform_2, window_bounds = array<i64: 1, 128>}, {pipeline_mode = #tpu.pipeline_mode<synchronous>, transform_indices = @transform_3, window_bounds = array<i64: 128, 128>}, {pipeline_mode = #tpu.pipeline_mode<synchronous>, transform_indices = @transform_4, window_bounds = array<i64: 1, 128>}, {pipeline_mode = #tpu.pipeline_mode<synchronous>, transform_indices = @transform_5, window_bounds = array<i64: 128, 128>}, {pipeline_mode = #tpu.pipeline_mode<synchronous>, transform_indices = @transform_6, window_bounds = array<i64: 1, 128>}, {pipeline_mode = #tpu.pipeline_mode<synchronous>, transform_indices = @transform_7, window_bounds = array<i64: 128, 128>}, {pipeline_mode = #tpu.pipeline_mode<synchronous>, transform_indices = @transform_8, window_bounds = array<i64: 2, 128>}]} {
    %c0 = arith.constant 0 : index
    %c0_0 = arith.constant 0 : index
    %0 = vector.load %arg1[%c0, %c0_0] : memref<2x256xf32, #tpu.memory_space<vmem>>, vector<2x256xf32>
    %c0_1 = arith.constant 0 : index
    %c0_2 = arith.constant 0 : index
    %1 = vector.load %arg2[%c0_1, %c0_2] : memref<256x128xf32, #tpu.memory_space<vmem>>, vector<256x128xf32>
    %cst = arith.constant dense<0.000000e+00> : vector<2x128xf32>
    %2 = tpu.matmul %0, %1, %cst {dimension_numbers = #tpu.dot_dimension_numbers<[1], [0], [0], [1], [0, 0, 1, 1], [], []>} : vector<2x256xf32>, vector<256x128xf32>, vector<2x128xf32> -> vector<2x128xf32>
    %c0_3 = arith.constant 0 : index
    %c0_4 = arith.constant 0 : index
    %3 = vector.load %arg3[%c0_3, %c0_4] : memref<1x128xf32, #tpu.memory_space<vmem>>, vector<1x128xf32>
    %4 = vector.broadcast %3 : vector<1x128xf32> to vector<2x128xf32>
    %5 = arith.addf %2, %4 : vector<2x128xf32>
    %cst_5 = arith.constant 0.000000e+00 : f32
    %6 = vector.broadcast %cst_5 : f32 to vector<2x128xf32>
    %7 = arith.maximumf %5, %6 : vector<2x128xf32>
    %c0_6 = arith.constant 0 : index
    %c0_7 = arith.constant 0 : index
    %8 = vector.load %arg4[%c0_6, %c0_7] : memref<128x128xf32, #tpu.memory_space<vmem>>, vector<128x128xf32>
    %cst_8 = arith.constant dense<0.000000e+00> : vector<2x128xf32>
    %9 = tpu.matmul %7, %8, %cst_8 {dimension_numbers = #tpu.dot_dimension_numbers<[1], [0], [0], [1], [0, 0, 1, 1], [], []>} : vector<2x128xf32>, vector<128x128xf32>, vector<2x128xf32> -> vector<2x128xf32>
    %c0_9 = arith.constant 0 : index
    %c0_10 = arith.constant 0 : index
    %10 = vector.load %arg5[%c0_9, %c0_10] : memref<1x128xf32, #tpu.memory_space<vmem>>, vector<1x128xf32>
    %11 = vector.broadcast %10 : vector<1x128xf32> to vector<2x128xf32>
    %12 = arith.addf %9, %11 : vector<2x128xf32>
    %cst_11 = arith.constant 0.000000e+00 : f32
    %13 = vector.broadcast %cst_11 : f32 to vector<2x128xf32>
    %14 = arith.maximumf %12, %13 : vector<2x128xf32>
    %c0_12 = arith.constant 0 : index
    %c0_13 = arith.constant 0 : index
    %15 = vector.load %arg6[%c0_12, %c0_13] : memref<128x128xf32, #tpu.memory_space<vmem>>, vector<128x128xf32>
    %cst_14 = arith.constant dense<0.000000e+00> : vector<2x128xf32>
    %16 = tpu.matmul %14, %15, %cst_14 {dimension_numbers = #tpu.dot_dimension_numbers<[1], [0], [0], [1], [0, 0, 1, 1], [], []>} : vector<2x128xf32>, vector<128x128xf32>, vector<2x128xf32> -> vector<2x128xf32>
    %c0_15 = arith.constant 0 : index
    %c0_16 = arith.constant 0 : index
    %17 = vector.load %arg7[%c0_15, %c0_16] : memref<1x128xf32, #tpu.memory_space<vmem>>, vector<1x128xf32>
    %18 = vector.broadcast %17 : vector<1x128xf32> to vector<2x128xf32>
    %19 = arith.addf %16, %18 : vector<2x128xf32>
    %cst_17 = arith.constant dense<0xFF800000> : vector<2xf32>
    %20 = vector.multi_reduction <maximumf>, %19, %cst_17 [1] : vector<2x128xf32> to vector<2xf32>
    %21 = vector.shape_cast %20 : vector<2xf32> to vector<2x1xf32>
    %22 = vector.broadcast %21 : vector<2x1xf32> to vector<2x128xf32>
    %23 = arith.subf %19, %22 : vector<2x128xf32>
    %24 = math.exp %23 : vector<2x128xf32>
    %c0_18 = arith.constant 0 : index
    %c0_19 = arith.constant 0 : index
    %25 = vector.load %arg8[%c0_18, %c0_19] : memref<128x128xf32, #tpu.memory_space<vmem>>, vector<128x128xf32>
    %cst_20 = arith.constant dense<0.000000e+00> : vector<2x128xf32>
    %26 = tpu.matmul %24, %25, %cst_20 {dimension_numbers = #tpu.dot_dimension_numbers<[1], [0], [0], [1], [0, 0, 1, 1], [], []>} : vector<2x128xf32>, vector<128x128xf32>, vector<2x128xf32> -> vector<2x128xf32>
    %cst_21 = arith.constant 0.000000e+00 : f32
    %27 = vector.broadcast %cst_21 : f32 to vector<2x128xf32>
    %28 = arith.cmpf ogt, %26, %27 : vector<2x128xf32>
    %cst_22 = arith.constant 1.000000e+00 : f32
    %29 = vector.broadcast %cst_22 : f32 to vector<2x128xf32>
    %30 = arith.select %28, %26, %29 : vector<2x128xi1>, vector<2x128xf32>
    %31 = arith.divf %24, %30 : vector<2x128xf32>
    %c0_23 = arith.constant 0 : index
    %c0_24 = arith.constant 0 : index
    %32 = vector.load %arg9[%c0_23, %c0_24] : memref<2x128xf32, #tpu.memory_space<vmem>>, vector<2x128xf32>
    tpu.vector_store %arg9[%c0_23, %c0_24], %31 {strides = array<i32>} : memref<2x128xf32, #tpu.memory_space<vmem>>, vector<2x128xf32>,
    return
  }
  func.func @transform_0(%arg0: i32) -> (i32, i32) {
    %c0_i32 = arith.constant 0 : i32
    %c0_i32_0 = arith.constant 0 : i32
    %c0_i32_1 = arith.constant 0 : i32
    return %c0_i32, %c0_i32_0 : i32, i32
  }
  func.func @transform_1(%arg0: i32) -> (i32, i32) {
    %c0_i32 = arith.constant 0 : i32
    %c0_i32_0 = arith.constant 0 : i32
    %c0_i32_1 = arith.constant 0 : i32
    return %c0_i32, %c0_i32_0 : i32, i32
  }
  func.func @transform_2(%arg0: i32) -> (i32, i32) {
    %c0_i32 = arith.constant 0 : i32
    %c0_i32_0 = arith.constant 0 : i32
    %c0_i32_1 = arith.constant 0 : i32
    return %c0_i32, %c0_i32_0 : i32, i32
  }
  func.func @transform_3(%arg0: i32) -> (i32, i32) {
    %c0_i32 = arith.constant 0 : i32
    %c0_i32_0 = arith.constant 0 : i32
    %c0_i32_1 = arith.constant 0 : i32
    return %c0_i32, %c0_i32_0 : i32, i32
  }
  func.func @transform_4(%arg0: i32) -> (i32, i32) {
    %c0_i32 = arith.constant 0 : i32
    %c0_i32_0 = arith.constant 0 : i32
    %c0_i32_1 = arith.constant 0 : i32
    return %c0_i32, %c0_i32_0 : i32, i32
  }
  func.func @transform_5(%arg0: i32) -> (i32, i32) {
    %c0_i32 = arith.constant 0 : i32
    %c0_i32_0 = arith.constant 0 : i32
    %c0_i32_1 = arith.constant 0 : i32
    return %c0_i32, %c0_i32_0 : i32, i32
  }
  func.func @transform_6(%arg0: i32) -> (i32, i32) {
    %c0_i32 = arith.constant 0 : i32
    %c0_i32_0 = arith.constant 0 : i32
    %c0_i32_1 = arith.constant 0 : i32
    return %c0_i32, %c0_i32_0 : i32, i32
  }
  func.func @transform_7(%arg0: i32) -> (i32, i32) {
    %c0_i32 = arith.constant 0 : i32
    %c0_i32_0 = arith.constant 0 : i32
    %c0_i32_1 = arith.constant 0 : i32
    return %c0_i32, %c0_i32_0 : i32, i32
  }
  func.func @transform_8(%arg0: i32) -> (i32, i32) {
    %c0_i32 = arith.constant 0 : i32
    %c0_i32_0 = arith.constant 0 : i32
    %c0_i32_1 = arith.constant 0 : i32
    return %c0_i32, %c0_i32_0 : i32, i32
  }
}

</mosaic_0001>

<bundles_post_ra>
// kernel: multihead_forward.3
= control target key start
LH: loop header
LB: loop body
LE: loop exit
PB: predicated region body
PF: predicated region fallthrough
CT: control target
= control target key end

     0   :  { %s481_s12 = smov 0   ;;  %s572_s0 = inlined_call_operand.vmem [shape: f32[1152,25], index: 0, kind: input, shape index: {}]   ;;  %s573_s1 = inlined_call_operand.vmem [shape: f32[25,128], index: 1, kind: input, shape index: {}]   ;;  %s574_s2 = inlined_call_operand.vmem [shape: f32[1,128], index: 2, kind: input, shape index: {}]   ;;  %s575_s3 = inlined_call_operand.vmem [shape: f32[1152,128], index: 3, kind: output, shape index: {}]  }
   0x1 LB: > { %s404_s13 = sadd.s32 4294967295, %s459_s12   ;;  %p408_p0 = scmp.ge.s32.totalorder %s459_s12, 1  ;;  %s459_s12 = sphi %s481_s12, %s13_s12  }
   0x2   : > { %p138_p1 = scmp.lt.s32.totalorder %s459_s12, 10 }
   0x4   : > { %p139_p2 = pnand %p408_p0, %p138_p1 }
   0x5   : > { %s409_s18 = sshll.u32 (!%p139_p2), %s404_s13, 4 }
   0x6   : > { %142 = sbr.rel (%p139_p2) target bundleno = 181 (0xb5), region = 32  ;;  %p163_p3 = scmp.lt.s32.totalorder (!%p139_p2), %s409_s18, 143 }
   0xb   : > { %v193_v0 = vld [vmem:[%s573_s1 + $0x18] sm:$0x1]  ;;  %vm247_vm0 = vcmask 1040384   ;;  %v192_v1 = vld [vmem:[%s573_s1 + $0x10] sm:$0xff]  ;;  %v191_v2 = vld [vmem:[%s573_s1 + $0x8] sm:$0xff]  ;;  %s577_s18 = smov (!%p163_p3, %s409_s18), 143 }
   0xc   : > { %433 = vmatpush.msk.msra.mxu2 %vm247_vm0, %v193_v0  ;;  %434 = vmatpush.msk.msra.mxu3 %vm247_vm0, %v193_v0  ;;  %v190_v3 = vld [vmem:[%s573_s1] sm:$0xff]  ;;  %s410_s23 = sshll.u32 %s577_s18, 3  ;;  %vm198_vm1 = vcmask 203776  }
   0xd   : > { %413 = vmatpush.msk.msra.mxu0 %vm247_vm0, %v193_v0  ;;  %432 = vmatpush.msk.msra.mxu1 %vm247_vm0, %v193_v0  ;;  %s509_s26 = scalar_lea.vmem %s572_s0, %s410_s23  ;;  %v452_v20 = vld [vmem:[%s574_s2] ss:$0 sm:$0xff]  ;;  %s551_s4 = scalar_lea.vmem %s575_s3, %s410_s23 }
   0xe   : > { %436 = vmatpush.msra.mxu2 %v192_v1  ;;  %437 = vmatpush.msra.mxu3 %v192_v1  ;;  %v182_v4 = vld [vmem:[%s509_s26 + $0x40] sm:$0xff]  ;;  %v183_v8 = vld [vmem:[%s509_s26 + $0x48] sm:$0xff]  ;;  %v184_v12 = vld [vmem:[%s509_s26 + $0x50] sm:$0xff] }
   0xf   : > { %264 = vmatpush.msra.mxu0 %v192_v1  ;;  %435 = vmatpush.msra.mxu1 %v192_v1  ;;  %v186_v5 = vld [vmem:[%s509_s26 + $0x60] sm:$0xff]  ;;  %v187_v9 = vld [vmem:[%s509_s26 + $0x68] sm:$0xff]  ;;  %v188_v13 = vld [vmem:[%s509_s26 + $0x70] sm:$0xff] }
  0x10   : > { %439 = vmatpush.msra.mxu2 %v191_v2  ;;  %440 = vmatpush.msra.mxu3 %v191_v2  ;;  %v174_v6 = vld [vmem:[%s509_s26] sm:$0xff]  ;;  %v175_v10 = vld [vmem:[%s509_s26 + $0x8] sm:$0xff]  ;;  %v176_v14 = vld [vmem:[%s509_s26 + $0x10] sm:$0xff] }
  0x11   : > { %265 = vmatpush.msra.mxu0 %v191_v2  ;;  %438 = vmatpush.msra.mxu1 %v191_v2  ;;  %v178_v7 = vld [vmem:[%s509_s26 + $0x20] sm:$0xff]  ;;  %v179_v11 = vld [vmem:[%s509_s26 + $0x28] sm:$0xff]  ;;  %v180_v15 = vld [vmem:[%s509_s26 + $0x30] sm:$0xff] }
  0x12   : > { %442 = vmatpush.msra.mxu2 %v190_v3  ;;  %443 = vmatpush.msra.mxu3 %v190_v3  ;;  %v185_v16 = vld [vmem:[%s509_s26 + $0x58] sm:$0xff] }
  0x13   : > { %422 = vmatmul.msk.f32.vlgmr.msra.gmra.mxu2 %vm198_vm1, %v182_v4  ;;  %426 = vmatmul.msk.f32.vlgmr.msra.gmra.mxu3 %vm198_vm1, %v186_v5  ;;  %v189_v17 = vld [vmem:[%s509_s26 + $0x78] sm:$0xff] }
  0x14   : > { %266 = vmatpush.msra.mxu0 %v190_v3  ;;  %441 = vmatpush.msra.mxu1 %v190_v3  ;;  %v177_v18 = vld [vmem:[%s509_s26 + $0x18] sm:$0xff] }
  0x15   : > { %414 = vmatmul.msk.f32.vlgmr.msra.gmra.mxu0 %vm198_vm1, %v174_v6  ;;  %418 = vmatmul.msk.f32.vlgmr.msra.gmra.mxu1 %vm198_vm1, %v178_v7  ;;  %v181_v19 = vld [vmem:[%s509_s26 + $0x38] sm:$0xff] }
  0x1b   : > { %423 = vmatmul.msk.f32.gmra.mxu2 %vm198_vm1, %v183_v8  ;;  %427 = vmatmul.msk.f32.gmra.mxu3 %vm198_vm1, %v187_v9 }
  0x1d   : > { %415 = vmatmul.msk.f32.gmra.mxu0 %vm198_vm1, %v175_v10  ;;  %419 = vmatmul.msk.f32.gmra.mxu1 %vm198_vm1, %v179_v11 }
  0x23   : > { %424 = vmatmul.msk.f32.gmra.mxu2 %vm198_vm1, %v184_v12  ;;  %428 = vmatmul.msk.f32.gmra.mxu3 %vm198_vm1, %v188_v13 }
  0x25   : > { %416 = vmatmul.msk.f32.gmra.mxu0 %vm198_vm1, %v176_v14  ;;  %420 = vmatmul.msk.f32.gmra.mxu1 %vm198_vm1, %v180_v15 }
  0x2b   : > { %425 = vmatmul.msk.f32.gmra.mxu2 %vm198_vm1, %v185_v16  ;;  %429 = vmatmul.msk.f32.gmra.mxu3 %vm198_vm1, %v189_v17 }
  0x2d   : > { %417 = vmatmul.msk.f32.gmra.mxu0 %vm198_vm1, %v177_v18  ;;  %421 = vmatmul.msk.f32.gmra.mxu1 %vm198_vm1, %v181_v19 }
  0x92   : > { %v268_v21 = vpop.f32.mrf.mxu0  ;;  %v280_v22 = vpop.f32.mrf.mxu1 }
  0x93   : > { %v269_v23 = vadd.f32 %v452_v20, %v268_v21  ;;  %v281_v24 = vadd.f32 %v452_v20, %v280_v22 }
  0x95   : > { %v316_v25 = vmax.f32 %v269_v23, 0.0  ;;  %v320_v26 = vmax.f32 %v281_v24, 0.0 }
  0x96   : > { %v292_v27 = vpop.f32.mrf.mxu2  ;;  %v304_v28 = vpop.f32.mrf.mxu3 }
  0x97   : > { %332 = vst [vmem:[%s551_s4] sm:$0xff] %v316_v25  ;;  %v293_v29 = vadd.f32 %v452_v20, %v292_v27  ;;  %v305_v30 = vadd.f32 %v452_v20, %v304_v28 }
  0x98   : > { %336 = vst [vmem:[%s551_s4 + $0x20] sm:$0xff] %v320_v26 }
  0x99   : > { %v324_v31 = vmax.f32 %v293_v29, 0.0  ;;  %v328_v32 = vmax.f32 %v305_v30, 0.0 }
  0x9a   : > { %v271_v33 = vpop.f32.mrf.mxu0  ;;  %v283_v34 = vpop.f32.mrf.mxu1 }
  0x9b   : > { %340 = vst [vmem:[%s551_s4 + $0x40] sm:$0xff] %v324_v31  ;;  %v272_v35 = vadd.f32 %v452_v20, %v271_v33  ;;  %v284_v36 = vadd.f32 %v452_v20, %v283_v34 }
  0x9c   : > { %344 = vst [vmem:[%s551_s4 + $0x60] sm:$0xff] %v328_v32 }
  0x9d   : > { %v317_v37 = vmax.f32 %v272_v35, 0.0  ;;  %v321_v38 = vmax.f32 %v284_v36, 0.0 }
  0x9e   : > { %v295_v39 = vpop.f32.mrf.mxu2  ;;  %v307_v40 = vpop.f32.mrf.mxu3 }
  0x9f   : > { %333 = vst [vmem:[%s551_s4 + $0x8] sm:$0xff] %v317_v37  ;;  %v296_v41 = vadd.f32 %v452_v20, %v295_v39  ;;  %v308_v42 = vadd.f32 %v452_v20, %v307_v40 }
  0xa0   : > { %337 = vst [vmem:[%s551_s4 + $0x28] sm:$0xff] %v321_v38 }
  0xa1   : > { %v325_v43 = vmax.f32 %v296_v41, 0.0  ;;  %v329_v44 = vmax.f32 %v308_v42, 0.0 }
  0xa2   : > { %v274_v45 = vpop.f32.mrf.mxu0  ;;  %v286_v46 = vpop.f32.mrf.mxu1 }
  0xa3   : > { %341 = vst [vmem:[%s551_s4 + $0x48] sm:$0xff] %v325_v43  ;;  %v275_v47 = vadd.f32 %v452_v20, %v274_v45  ;;  %v287_v48 = vadd.f32 %v452_v20, %v286_v46 }
  0xa4   : > { %345 = vst [vmem:[%s551_s4 + $0x68] sm:$0xff] %v329_v44 }
  0xa5   : > { %v318_v49 = vmax.f32 %v275_v47, 0.0  ;;  %v322_v50 = vmax.f32 %v287_v48, 0.0 }
  0xa6   : > { %v298_v51 = vpop.f32.mrf.mxu2  ;;  %v310_v52 = vpop.f32.mrf.mxu3 }
  0xa7   : > { %334 = vst [vmem:[%s551_s4 + $0x10] sm:$0xff] %v318_v49  ;;  %v299_v53 = vadd.f32 %v452_v20, %v298_v51  ;;  %v311_v54 = vadd.f32 %v452_v20, %v310_v52 }
  0xa8   : > { %338 = vst [vmem:[%s551_s4 + $0x30] sm:$0xff] %v322_v50 }
  0xa9   : > { %v326_v55 = vmax.f32 %v299_v53, 0.0  ;;  %v330_v56 = vmax.f32 %v311_v54, 0.0 }
  0xaa   : > { %v277_v57 = vpop.f32.mrf.mxu0  ;;  %v289_v58 = vpop.f32.mrf.mxu1 }
  0xab   : > { %342 = vst [vmem:[%s551_s4 + $0x50] sm:$0xff] %v326_v55  ;;  %v278_v59 = vadd.f32 %v452_v20, %v277_v57  ;;  %v290_v60 = vadd.f32 %v452_v20, %v289_v58 }
  0xac   : > { %346 = vst [vmem:[%s551_s4 + $0x70] sm:$0xff] %v330_v56 }
  0xad   : > { %v319_v61 = vmax.f32 %v278_v59, 0.0  ;;  %v323_v62 = vmax.f32 %v290_v60, 0.0 }
  0xae   : > { %v301_v63 = vpop.f32.mrf.mxu2  ;;  %v313_v0 = vpop.f32.mrf.mxu3 }
  0xaf   : > { %335 = vst [vmem:[%s551_s4 + $0x18] sm:$0xff] %v319_v61  ;;  %v302_v1 = vadd.f32 %v452_v20, %v301_v63  ;;  %v314_v2 = vadd.f32 %v452_v20, %v313_v0 }
  0xb0   : > { %339 = vst [vmem:[%s551_s4 + $0x38] sm:$0xff] %v323_v62 }
  0xb1   : > { %v327_v3 = vmax.f32 %v302_v1, 0.0  ;;  %v331_v4 = vmax.f32 %v314_v2, 0.0 }
  0xb3   : > { %343 = vst [vmem:[%s551_s4 + $0x58] sm:$0xff] %v327_v3 }
  0xb4   : > { %347 = vst [vmem:[%s551_s4 + $0x78] sm:$0xff] %v331_v4 }
  0xb5 PF: > { %s13_s12 = sadd.s32 1, %s459_s12  }
  0xb6   : > { %p10_p4 = scmp.ge.s32.totalorder %s13_s12, 11  }
  0xb8   :  { %12 = sbr.rel (!%p10_p4) target bundleno = 1 (0x1), region = 62 }

// kernel: multihead_forward.4
= control target key start
LH: loop header
LB: loop body
LE: loop exit
PB: predicated region body
PF: predicated region fallthrough
CT: control target
= control target key end

     0   :  { %vm118_vm0 = vcmask 1045504   ;;  %vm69_vm1 = vcmask 179200   ;;  %s616_s1 = inlined_call_operand.vmem [shape: f32[150,128], index: 1, kind: input, shape index: {}]   ;;  %s617_s0 = inlined_call_operand.vmem [shape: f32[128,150], index: 0, kind: input, shape index: {}]   ;;  %s618_s2 = inlined_call_operand.vmem [shape: f32[1,128], index: 2, kind: input, shape index: {}]   ;;  %s619_s3 = inlined_call_operand.vmem [shape: f32[128,128], index: 3, kind: output, shape index: {}]  }
   0x1   :  { %v61_v0 = vld [vmem:[%s616_s1 + $0x78] sm:$0xff]  ;;  %v367_v1 = vld [vmem:[%s616_s1 + $0x90] sm:$0x3f]  ;;  %v375_v3 = vld [vmem:[%s616_s1 + $0x88] sm:$0xff] }
   0x2   :  { %v60_v2 = vld [vmem:[%s616_s1 + $0x70] sm:$0xff]  ;;  %122 = vmatpush.msra.mxu0 %v61_v0  ;;  %305 = vmatpush.msra.mxu2 %v61_v0  ;;  %v59_v4 = vld [vmem:[%s616_s1 + $0x68] sm:$0xff]  ;;  %v385_v5 = vld [vmem:[%s616_s1 + $0x80] sm:$0xff] }
   0x3   :  { %306 = vmatpush.msra.mxu3 %v61_v0  ;;  %288 = vmatpush.msk.msra.mxu1 %vm118_vm0, %v367_v1  ;;  %v15_v6 = vld [vmem:[%s617_s0 + $0x8] sm:$0xff]  ;;  %v58_v7 = vld [vmem:[%s616_s1 + $0x60] sm:$0xff]  ;;  %v57_v8 = vld [vmem:[%s616_s1 + $0x58] sm:$0xff] }
   0x4   :  { %123 = vmatpush.msra.mxu0 %v60_v2  ;;  %307 = vmatpush.msra.mxu2 %v60_v2  ;;  %v56_v9 = vld [vmem:[%s616_s1 + $0x50] sm:$0xff]  ;;  %v55_v10 = vld [vmem:[%s616_s1 + $0x48] sm:$0xff]  ;;  %v17_v11 = vld [vmem:[%s617_s0 + $0x18] sm:$0xff] }
   0x5   :  { %308 = vmatpush.msra.mxu3 %v60_v2  ;;  %201 = vmatpush.msra.mxu1 %v375_v3  ;;  %v54_v12 = vld [vmem:[%s616_s1 + $0x40] sm:$0xff]  ;;  %v53_v13 = vld [vmem:[%s616_s1 + $0x38] sm:$0xff]  ;;  %v52_v14 = vld [vmem:[%s616_s1 + $0x30] sm:$0xff] }
   0x6   :  { %124 = vmatpush.msra.mxu0 %v59_v4  ;;  %309 = vmatpush.msra.mxu2 %v59_v4  ;;  %v51_v15 = vld [vmem:[%s616_s1 + $0x28] sm:$0xff]  ;;  %v50_v17 = vld [vmem:[%s616_s1 + $0x20] sm:$0xff]  ;;  %v49_v18 = vld [vmem:[%s616_s1 + $0x18] sm:$0xff] }
   0x7   :  { %310 = vmatpush.msra.mxu3 %v59_v4  ;;  %202 = vmatpush.msra.mxu1 %v385_v5  ;;  %v19_v16 = vld [vmem:[%s617_s0 + $0x28] sm:$0xff]  ;;  %v48_v19 = vld [vmem:[%s616_s1 + $0x10] sm:$0xff]  ;;  %v21_v21 = vld [vmem:[%s617_s0 + $0x38] sm:$0xff] }
   0x8   :  { %289 = vmatmul.msk.f32.vlgmr.msra.gmra.mxu1 %vm69_vm1, %v15_v6  ;;  %125 = vmatpush.msra.mxu0 %v58_v7  ;;  %v47_v20 = vld [vmem:[%s616_s1 + $0x8] sm:$0xff]  ;;  %v46_v22 = vld [vmem:[%s616_s1] sm:$0xff]  ;;  %v28_v24 = vld [vmem:[%s617_s0 + $0x70] sm:$0xff] }
   0x9   :  { %311 = vmatpush.msra.mxu2 %v58_v7  ;;  %312 = vmatpush.msra.mxu3 %v58_v7  ;;  %v14_v23 = vld [vmem:[%s617_s0] sm:$0xff]  ;;  %v44_v25 = vld [vmem:[%s617_s0 + $0xf0] sm:$0xff]  ;;  %v23_v26 = vld [vmem:[%s617_s0 + $0x48] sm:$0xff] }
   0xa   :  { %126 = vmatpush.msra.mxu0 %v57_v8  ;;  %v16_v27 = vld [vmem:[%s617_s0 + $0x10] sm:$0xff]  ;;  %v30_v28 = vld [vmem:[%s617_s0 + $0x80] sm:$0xff]  ;;  %v35_v29 = vld [vmem:[%s617_s0 + $0xa8] sm:$0xff] }
   0xb   :  { %313 = vmatpush.msra.mxu2 %v57_v8  ;;  %314 = vmatpush.msra.mxu3 %v57_v8  ;;  %v25_v30 = vld [vmem:[%s617_s0 + $0x58] sm:$0xff]  ;;  %v18_v31 = vld [vmem:[%s617_s0 + $0x20] sm:$0xff]  ;;  %v32_v32 = vld [vmem:[%s617_s0 + $0x90] sm:$0xff] }
   0xc   :  { %127 = vmatpush.msra.mxu0 %v56_v9  ;;  %v37_v33 = vld [vmem:[%s617_s0 + $0xb8] sm:$0xff]  ;;  %v27_v34 = vld [vmem:[%s617_s0 + $0x68] sm:$0xff]  ;;  %v20_v35 = vld [vmem:[%s617_s0 + $0x30] sm:$0xff] }
   0xd   :  { %315 = vmatpush.msra.mxu2 %v56_v9  ;;  %316 = vmatpush.msra.mxu3 %v56_v9  ;;  %v34_v36 = vld [vmem:[%s617_s0 + $0xa0] sm:$0xff]  ;;  %v39_v37 = vld [vmem:[%s617_s0 + $0xc8] sm:$0xff]  ;;  %v29_v38 = vld [vmem:[%s617_s0 + $0x78] sm:$0xff] }
   0xe   :  { %128 = vmatpush.msra.mxu0 %v55_v10  ;;  %v22_v39 = vld [vmem:[%s617_s0 + $0x40] sm:$0xff]  ;;  %v36_v40 = vld [vmem:[%s617_s0 + $0xb0] sm:$0xff]  ;;  %v41_v41 = vld [vmem:[%s617_s0 + $0xd8] sm:$0xff] }
   0xf   :  { %317 = vmatpush.msra.mxu2 %v55_v10  ;;  %318 = vmatpush.msra.mxu3 %v55_v10  ;;  %v31_v42 = vld [vmem:[%s617_s0 + $0x88] sm:$0xff]  ;;  %v24_v43 = vld [vmem:[%s617_s0 + $0x50] sm:$0xff]  ;;  %v38_v44 = vld [vmem:[%s617_s0 + $0xc0] sm:$0xff] }
  0x10   :  { %290 = vmatmul.msk.f32.gmra.mxu1 %vm69_vm1, %v17_v11  ;;  %129 = vmatpush.msra.mxu0 %v54_v12  ;;  %v43_v45 = vld [vmem:[%s617_s0 + $0xe8] sm:$0xff]  ;;  %v33_v46 = vld [vmem:[%s617_s0 + $0x98] sm:$0xff]  ;;  %v26_v47 = vld [vmem:[%s617_s0 + $0x60] sm:$0xff] }
  0x11   :  { %319 = vmatpush.msra.mxu2 %v54_v12  ;;  %320 = vmatpush.msra.mxu3 %v54_v12  ;;  %v40_v48 = vld [vmem:[%s617_s0 + $0xd0] sm:$0xff]  ;;  %v45_v49 = vld [vmem:[%s617_s0 + $0xf8] sm:$0xff]  ;;  %v42_v50 = vld [vmem:[%s617_s0 + $0xe0] sm:$0xff] }
  0x12   :  { %130 = vmatpush.msra.mxu0 %v53_v13  ;;  %v547_v54 = vld [vmem:[%s618_s2] ss:$0 sm:$0xff] }
  0x13   :  { %321 = vmatpush.msra.mxu2 %v53_v13  ;;  %322 = vmatpush.msra.mxu3 %v53_v13 }
  0x14   :  { %131 = vmatpush.msra.mxu0 %v52_v14 }
  0x15   :  { %323 = vmatpush.msra.mxu2 %v52_v14  ;;  %324 = vmatpush.msra.mxu3 %v52_v14 }
  0x16   :  { %132 = vmatpush.msra.mxu0 %v51_v15 }
  0x17   :  { %325 = vmatpush.msra.mxu2 %v51_v15  ;;  %326 = vmatpush.msra.mxu3 %v51_v15 }
  0x18   :  { %291 = vmatmul.msk.f32.gmra.mxu1 %vm69_vm1, %v19_v16  ;;  %133 = vmatpush.msra.mxu0 %v50_v17 }
  0x19   :  { %327 = vmatpush.msra.mxu2 %v50_v17  ;;  %328 = vmatpush.msra.mxu3 %v50_v17 }
  0x1a   :  { %134 = vmatpush.msra.mxu0 %v49_v18 }
  0x1b   :  { %329 = vmatpush.msra.mxu2 %v49_v18  ;;  %330 = vmatpush.msra.mxu3 %v49_v18 }
  0x1c   :  { %135 = vmatpush.msra.mxu0 %v48_v19 }
  0x1d   :  { %331 = vmatpush.msra.mxu2 %v48_v19  ;;  %332 = vmatpush.msra.mxu3 %v48_v19 }
  0x1e   :  { %136 = vmatpush.msra.mxu0 %v47_v20 }
  0x1f   :  { %333 = vmatpush.msra.mxu2 %v47_v20  ;;  %334 = vmatpush.msra.mxu3 %v47_v20 }
  0x20   :  { %292 = vmatmul.msk.f32.gmra.mxu1 %vm69_vm1, %v21_v21  ;;  %137 = vmatpush.msra.mxu0 %v46_v22 }
  0x21   :  { %335 = vmatpush.msra.mxu2 %v46_v22  ;;  %336 = vmatpush.msra.mxu3 %v46_v22 }
  0x22   :  { %138 = vmatmul.f32.vlgmr.msra.gmra.mxu0 %v14_v23  ;;  %159 = vmatmul.f32.vlgmr.msra.gmra.mxu2 %v28_v24 }
  0x23   :  { %183 = vmatmul.f32.vlgmr.msra.gmra.mxu3 %v44_v25 }
  0x24   :  { %337 = vmatpush.msk.msrb.mxu3 %vm118_vm0, %v367_v1 }
  0x26   :  { %338 = vmatpush.msrb.mxu3 %v375_v3 }
  0x28   :  { %293 = vmatmul.msk.f32.gmra.mxu1 %vm69_vm1, %v23_v26  ;;  %339 = vmatpush.msrb.mxu3 %v385_v5 }
  0x2a   :  { %141 = vmatmul.f32.gmra.mxu0 %v16_v27  ;;  %162 = vmatmul.f32.gmra.mxu2 %v30_v28 }
  0x2b   :  { %299 = vmatmul.msk.f32.vlgmr.msrb.gmra.mxu3 %vm69_vm1, %v35_v29 }
  0x30   :  { %294 = vmatmul.msk.f32.gmra.mxu1 %vm69_vm1, %v25_v30 }
  0x32   :  { %144 = vmatmul.f32.gmra.mxu0 %v18_v31  ;;  %165 = vmatmul.f32.gmra.mxu2 %v32_v32 }
  0x33   :  { %300 = vmatmul.msk.f32.gmra.mxu3 %vm69_vm1, %v37_v33 }
  0x38   :  { %295 = vmatmul.msk.f32.gmra.mxu1 %vm69_vm1, %v27_v34 }
  0x3a   :  { %147 = vmatmul.f32.gmra.mxu0 %v20_v35  ;;  %168 = vmatmul.f32.gmra.mxu2 %v34_v36 }
  0x3b   :  { %301 = vmatmul.msk.f32.gmra.mxu3 %vm69_vm1, %v39_v37 }
  0x40   :  { %296 = vmatmul.msk.f32.gmra.mxu1 %vm69_vm1, %v29_v38 }
  0x42   :  { %150 = vmatmul.f32.gmra.mxu0 %v22_v39  ;;  %171 = vmatmul.f32.gmra.mxu2 %v36_v40 }
  0x43   :  { %302 = vmatmul.msk.f32.gmra.mxu3 %vm69_vm1, %v41_v41 }
  0x48   :  { %297 = vmatmul.msk.f32.gmra.mxu1 %vm69_vm1, %v31_v42 }
  0x4a   :  { %153 = vmatmul.f32.gmra.mxu0 %v24_v43  ;;  %174 = vmatmul.f32.gmra.mxu2 %v38_v44 }
  0x4b   :  { %303 = vmatmul.msk.f32.gmra.mxu3 %vm69_vm1, %v43_v45 }
  0x50   :  { %298 = vmatmul.msk.f32.gmra.mxu1 %vm69_vm1, %v33_v46 }
  0x52   :  { %156 = vmatmul.f32.gmra.mxu0 %v26_v47  ;;  %177 = vmatmul.f32.gmra.mxu2 %v40_v48 }
  0x53   :  { %304 = vmatmul.msk.f32.gmra.mxu3 %vm69_vm1, %v45_v49 }
  0x5a   :  { %180 = vmatmul.f32.gmra.mxu2 %v42_v50 }
  0x85   :  { %v204_v51 = vpop.f32.mrf.mxu1 }
  0x8d   :  { %v207_v52 = vpop.f32.mrf.mxu1 }
  0x95   :  { %v210_v53 = vpop.f32.mrf.mxu1 }
  0x9d   :  { %v213_v55 = vpop.f32.mrf.mxu1 }
  0x9f   :  { %v139_v56 = vpop.f32.mrf.mxu0 }
  0xa0   :  { %v140_v57 = vadd.f32 %v547_v54, %v139_v56 }
  0xa2   :  { %v205_v58 = vadd.f32 %v204_v51, %v140_v57 }
  0xa4   :  { %v252_v59 = vmax.f32 %v205_v58, 0.0 }
  0xa5   :  { %v160_v60 = vpop.f32.mrf.mxu2  ;;  %v216_v61 = vpop.f32.mrf.mxu1 }
  0xa6   :  { %268 = vst [vmem:[%s619_s3] sm:$0xff] %v252_v59  ;;  %v553_v62 = vpop.f32.mrf.mxu3  ;;  %v161_v16 = vadd.f32 %v547_v54, %v160_v60 }
  0xa7   :  { %v142_v63 = vpop.f32.mrf.mxu0  ;;  %v185_v57 = vadd.f32 %v547_v54, %v553_v62 }
  0xa8   :  { %v143_v0 = vadd.f32 %v547_v54, %v142_v63 }
  0xaa   :  { %v208_v1 = vadd.f32 %v207_v52, %v143_v0 }
  0xac   :  { %v253_v2 = vmax.f32 %v208_v1, 0.0 }
  0xad   :  { %v163_v3 = vpop.f32.mrf.mxu2  ;;  %v219_v4 = vpop.f32.mrf.mxu1 }
  0xae   :  { %269 = vst [vmem:[%s619_s3 + $0x8] sm:$0xff] %v253_v2  ;;  %v234_v5 = vpop.f32.mrf.mxu3  ;;  %v164_v29 = vadd.f32 %v547_v54, %v163_v3 }
  0xaf   :  { %v145_v6 = vpop.f32.mrf.mxu0 }
  0xb0   :  { %v146_v7 = vadd.f32 %v547_v54, %v145_v6 }
  0xb2   :  { %v211_v8 = vadd.f32 %v210_v53, %v146_v7 }
  0xb4   :  { %v254_v9 = vmax.f32 %v211_v8, 0.0 }
  0xb5   :  { %v166_v10 = vpop.f32.mrf.mxu2  ;;  %v222_v11 = vpop.f32.mrf.mxu1 }
  0xb6   :  { %270 = vst [vmem:[%s619_s3 + $0x10] sm:$0xff] %v254_v9  ;;  %v237_v12 = vpop.f32.mrf.mxu3  ;;  %v167_v42 = vadd.f32 %v547_v54, %v166_v10 }
  0xb7   :  { %v148_v13 = vpop.f32.mrf.mxu0 }
  0xb8   :  { %v149_v14 = vadd.f32 %v547_v54, %v148_v13 }
  0xba   :  { %v214_v15 = vadd.f32 %v213_v55, %v149_v14 }
  0xbc   :  { %v255_v17 = vmax.f32 %v214_v15, 0.0 }
  0xbd   :  { %v169_v18 = vpop.f32.mrf.mxu2  ;;  %v225_v19 = vpop.f32.mrf.mxu1 }
  0xbe   :  { %271 = vst [vmem:[%s619_s3 + $0x18] sm:$0xff] %v255_v17  ;;  %v170_v20 = vadd.f32 %v547_v54, %v169_v18  ;;  %v226_v21 = vadd.f32 %v225_v19, %v161_v16  ;;  %v240_v22 = vpop.f32.mrf.mxu3 }
  0xbf   :  { %v151_v23 = vpop.f32.mrf.mxu0 }
  0xc0   :  { %v235_v24 = vadd.f32 %v234_v5, %v170_v20  ;;  %v259_v25 = vmax.f32 %v226_v21, 0.0  ;;  %v152_v26 = vadd.f32 %v547_v54, %v151_v23 }
  0xc2   :  { %v262_v27 = vmax.f32 %v235_v24, 0.0  ;;  %275 = vst [vmem:[%s619_s3 + $0x38] sm:$0xff] %v259_v25  ;;  %v217_v28 = vadd.f32 %v216_v61, %v152_v26 }
  0xc4   :  { %278 = vst [vmem:[%s619_s3 + $0x50] sm:$0xff] %v262_v27  ;;  %v256_v30 = vmax.f32 %v217_v28, 0.0 }
  0xc5   :  { %v172_v31 = vpop.f32.mrf.mxu2  ;;  %v228_v32 = vpop.f32.mrf.mxu1 }
  0xc6   :  { %272 = vst [vmem:[%s619_s3 + $0x20] sm:$0xff] %v256_v30  ;;  %v173_v33 = vadd.f32 %v547_v54, %v172_v31  ;;  %v229_v34 = vadd.f32 %v228_v32, %v164_v29  ;;  %v243_v35 = vpop.f32.mrf.mxu3 }
  0xc7   :  { %v154_v36 = vpop.f32.mrf.mxu0 }
  0xc8   :  { %v238_v37 = vadd.f32 %v237_v12, %v173_v33  ;;  %v260_v38 = vmax.f32 %v229_v34, 0.0  ;;  %v155_v39 = vadd.f32 %v547_v54, %v154_v36 }
  0xca   :  { %v263_v40 = vmax.f32 %v238_v37, 0.0  ;;  %276 = vst [vmem:[%s619_s3 + $0x40] sm:$0xff] %v260_v38  ;;  %v220_v41 = vadd.f32 %v219_v4, %v155_v39 }
  0xcc   :  { %279 = vst [vmem:[%s619_s3 + $0x58] sm:$0xff] %v263_v40  ;;  %v257_v43 = vmax.f32 %v220_v41, 0.0 }
  0xcd   :  { %v175_v44 = vpop.f32.mrf.mxu2  ;;  %v231_v45 = vpop.f32.mrf.mxu1 }
  0xce   :  { %273 = vst [vmem:[%s619_s3 + $0x28] sm:$0xff] %v257_v43  ;;  %v176_v46 = vadd.f32 %v547_v54, %v175_v44  ;;  %v232_v47 = vadd.f32 %v231_v45, %v167_v42  ;;  %v246_v48 = vpop.f32.mrf.mxu3 }
  0xcf   :  { %v157_v49 = vpop.f32.mrf.mxu0 }
  0xd0   :  { %v241_v50 = vadd.f32 %v240_v22, %v176_v46  ;;  %v261_v51 = vmax.f32 %v232_v47, 0.0  ;;  %v158_v52 = vadd.f32 %v547_v54, %v157_v49 }
  0xd2   :  { %v264_v53 = vmax.f32 %v241_v50, 0.0  ;;  %277 = vst [vmem:[%s619_s3 + $0x48] sm:$0xff] %v261_v51  ;;  %v223_v55 = vadd.f32 %v222_v11, %v158_v52 }
  0xd4   :  { %280 = vst [vmem:[%s619_s3 + $0x60] sm:$0xff] %v264_v53  ;;  %v258_v56 = vmax.f32 %v223_v55, 0.0 }
  0xd5   :  { %v178_v58 = vpop.f32.mrf.mxu2 }
  0xd6   :  { %274 = vst [vmem:[%s619_s3 + $0x30] sm:$0xff] %v258_v56  ;;  %v179_v59 = vadd.f32 %v547_v54, %v178_v58  ;;  %v249_v60 = vpop.f32.mrf.mxu3 }
  0xd7   :  { %v250_v61 = vadd.f32 %v249_v60, %v185_v57 }
  0xd8   :  { %v244_v63 = vadd.f32 %v243_v35, %v179_v59 }
  0xd9   :  { %v267_v0 = vmax.f32 %v250_v61, 0.0 }
  0xda   :  { %v265_v1 = vmax.f32 %v244_v63, 0.0 }
  0xdb   :  { %283 = vst [vmem:[%s619_s3 + $0x78] sm:$0xff] %v267_v0 }
  0xdc   :  { %281 = vst [vmem:[%s619_s3 + $0x68] sm:$0xff] %v265_v1 }
  0xdd   :  { %v181_v62 = vpop.f32.mrf.mxu2 }
  0xde   :  { %v182_v2 = vadd.f32 %v547_v54, %v181_v62 }
  0xe0   :  { %v247_v3 = vadd.f32 %v246_v48, %v182_v2 }
  0xe2   :  { %v266_v4 = vmax.f32 %v247_v3, 0.0 }
  0xe4   :  { %282 = vst [vmem:[%s619_s3 + $0x70] sm:$0xff] %v266_v4 }

// kernel: multihead_forward.5
= control target key start
LH: loop header
LB: loop body
LE: loop exit
PB: predicated region body
PF: predicated region fallthrough
CT: control target
= control target key end

     0   :  { %s607_s0 = inlined_call_operand.vmem [shape: f32[2,256], index: 0, kind: input, shape index: {}]   ;;  %s608_s1 = inlined_call_operand.vmem [shape: f32[256,128], index: 1, kind: input, shape index: {}]   ;;  %s609_s2 = inlined_call_operand.vmem [shape: f32[1,128], index: 2, kind: input, shape index: {}]   ;;  %s610_s3 = inlined_call_operand.vmem [shape: f32[128,128], index: 3, kind: input, shape index: {}]   ;;  %s611_s4 = inlined_call_operand.vmem [shape: f32[1,128], index: 4, kind: input, shape index: {}]   ;;  %s612_s5 = inlined_call_operand.vmem [shape: f32[128,128], index: 5, kind: input, shape index: {}]   ;;  %s613_s6 = inlined_call_operand.vmem [shape: f32[1,128], index: 6, kind: input, shape index: {}]   ;;  %s614_s7 = inlined_call_operand.vmem [shape: f32[128,128], index: 7, kind: input, shape index: {}]   ;;  %s615_s8 = inlined_call_operand.hbm [shape: f32[2,128], index: 8, kind: output, shape index: {}]  }
   0x1   :  { %v46_v0 = vld [vmem:[%s608_s1 + $0x78] sm:$0xff]  ;;  %v45_v1 = vld [vmem:[%s608_s1 + $0x70] sm:$0xff]  ;;  %v44_v4 = vld [vmem:[%s608_s1 + $0x68] sm:$0xff] }
   0x2   :  { %v62_v2 = vld [vmem:[%s608_s1 + $0xf8] sm:$0xff]  ;;  %73 = vmatpush.msra.mxu0 %v46_v0  ;;  %v61_v3 = vld [vmem:[%s608_s1 + $0xf0] sm:$0xff]  ;;  %v60_v5 = vld [vmem:[%s608_s1 + $0xe8] sm:$0xff] }
   0x3   :  { %93 = vmatpush.msra.mxu1 %v62_v2  ;;  %v43_v6 = vld [vmem:[%s608_s1 + $0x60] sm:$0xff]  ;;  %v42_v8 = vld [vmem:[%s608_s1 + $0x58] sm:$0xff]  ;;  %v41_v10 = vld [vmem:[%s608_s1 + $0x50] sm:$0xff] }
   0x4   :  { %74 = vmatpush.msra.mxu0 %v45_v1  ;;  %v59_v7 = vld [vmem:[%s608_s1 + $0xe0] sm:$0xff]  ;;  %v58_v9 = vld [vmem:[%s608_s1 + $0xd8] sm:$0xff]  ;;  %v57_v11 = vld [vmem:[%s608_s1 + $0xd0] sm:$0xff] }
   0x5   :  { %94 = vmatpush.msra.mxu1 %v61_v3  ;;  %v40_v12 = vld [vmem:[%s608_s1 + $0x48] sm:$0xff]  ;;  %v30_v14 = vld [vmem:[%s607_s0] sm:$0xf]  ;;  %v129_v15 = vld [vmem:[%s610_s3 + $0x78] sm:$0xff] }
   0x6   :  { %75 = vmatpush.msra.mxu0 %v44_v4  ;;  %v56_v13 = vld [vmem:[%s608_s1 + $0xc8] sm:$0xff]  ;;  %68 = vst [vmem:[#allocation1] ss:$4 sm:$0xff] %v30_v14  ;;  %v128_v16 = vld [vmem:[%s610_s3 + $0x70] sm:$0xff]  ;;  %v39_v17 = vld [vmem:[%s608_s1 + $0x40] sm:$0xff]  ;;  %134 = vmatpush.msra.mxu2 %v129_v15 }
   0x7   :  { %95 = vmatpush.msra.mxu1 %v60_v5  ;;  %v55_v18 = vld [vmem:[%s608_s1 + $0xc0] sm:$0xff]  ;;  %v127_v19 = vld [vmem:[%s610_s3 + $0x68] sm:$0xff]  ;;  %v38_v20 = vld [vmem:[%s608_s1 + $0x38] sm:$0xff] }
   0x8   :  { %76 = vmatpush.msra.mxu0 %v43_v6  ;;  %v37_v21 = vld [vmem:[%s608_s1 + $0x30] sm:$0xff]  ;;  %v54_v22 = vld [vmem:[%s608_s1 + $0xb8] sm:$0xff]  ;;  %135 = vmatpush.msra.mxu2 %v128_v16  ;;  %v126_v23 = vld [vmem:[%s610_s3 + $0x60] sm:$0xff] }
   0x9   :  { %96 = vmatpush.msra.mxu1 %v59_v7  ;;  %v53_v24 = vld [vmem:[%s608_s1 + $0xb0] sm:$0xff] }
   0xa   :  { %77 = vmatpush.msra.mxu0 %v42_v8  ;;  %136 = vmatpush.msra.mxu2 %v127_v19 }
   0xb   :  { %97 = vmatpush.msra.mxu1 %v58_v9 }
   0xc   :  { %78 = vmatpush.msra.mxu0 %v41_v10 }
   0xd   :  { %98 = vmatpush.msra.mxu1 %v57_v11 }
   0xe   :  { %79 = vmatpush.msra.mxu0 %v40_v12 }
   0xf   :  { %99 = vmatpush.msra.mxu1 %v56_v13 }
  0x10   :  { %80 = vmatpush.msra.mxu0 %v39_v17 }
  0x11   :  { %100 = vmatpush.msra.mxu1 %v55_v18 }
  0x12   :  { %13 = vsyncpa [#allocation3], 0  ;;  %81 = vmatpush.msra.mxu0 %v38_v20  ;;  %v125_v25 = vld [vmem:[%s610_s3 + $0x58] sm:$0xff]  ;;  %v36_v26 = vld [vmem:[%s608_s1 + $0x28] sm:$0xff]  ;;  %137 = vmatpush.msra.mxu2 %v126_v23  ;;  %vm195_vm0 = vcmask 1041408   ;;  %s263_s25 = sshll.u32 %s615_s8, 4  ;;  %s264_s25 = int_to_ptr.hbm [resolvable:$true] %s263_s25 }
  0x13   :  { %101 = vmatpush.msra.mxu1 %v54_v22  ;;  %v52_v27 = vld [vmem:[%s608_s1 + $0xa8] sm:$0xff]  ;;  %v124_v28 = vld [vmem:[%s610_s3 + $0x50] sm:$0xff]  ;;  %v35_v29 = vld [vmem:[%s608_s1 + $0x20] sm:$0xff] }
  0x14   :  { %82 = vmatpush.msra.mxu0 %v37_v21  ;;  %v51_v30 = vld [vmem:[%s608_s1 + $0xa0] sm:$0xff]  ;;  %138 = vmatpush.msra.mxu2 %v125_v25  ;;  %v123_v31 = vld [vmem:[%s610_s3 + $0x48] sm:$0xff]  ;;  %v34_v32 = vld [vmem:[%s608_s1 + $0x18] sm:$0xff] }
  0x15   :  { %102 = vmatpush.msra.mxu1 %v53_v24  ;;  %v50_v33 = vld [vmem:[%s608_s1 + $0x98] sm:$0xff]  ;;  %v122_v34 = vld [vmem:[%s610_s3 + $0x40] sm:$0xff]  ;;  %v33_v35 = vld [vmem:[%s608_s1 + $0x10] sm:$0xff] }
  0x16   :  { %83 = vmatpush.msra.mxu0 %v36_v26  ;;  %139 = vmatpush.msra.mxu2 %v124_v28  ;;  %v49_v36 = vld [vmem:[%s608_s1 + $0x90] sm:$0xff]  ;;  %v121_v37 = vld [vmem:[%s610_s3 + $0x38] sm:$0xff]  ;;  %v32_v38 = vld [vmem:[%s608_s1 + $0x8] sm:$0xff] }
  0x17   :  { %103 = vmatpush.msra.mxu1 %v52_v27  ;;  %v48_v39 = vld [vmem:[%s608_s1 + $0x88] sm:$0xff]  ;;  %v120_v40 = vld [vmem:[%s610_s3 + $0x30] sm:$0xff]  ;;  %v31_v41 = vld [vmem:[%s608_s1] sm:$0xff] }
  0x18   :  { %84 = vmatpush.msra.mxu0 %v35_v29  ;;  %140 = vmatpush.msra.mxu2 %v123_v31  ;;  %v47_v42 = vld [vmem:[%s608_s1 + $0x80] sm:$0xff]  ;;  %v70_v44 = vld.sshfl [vmem:[#allocation1 + $0x8] sm:$0xff pattern:$0x73625140]  ;;  %v117_v47 = vld [vmem:[%s610_s3 + $0x18] sm:$0xff] }
  0x19   :  { %104 = vmatpush.msra.mxu1 %v51_v30  ;;  %v69_v43 = vld.sshfl [vmem:[#allocation1] sm:$0xff pattern:$0x73625140]  ;;  %v119_v45 = vld [vmem:[%s610_s3 + $0x28] sm:$0xff]  ;;  %v116_v48 = vld [vmem:[%s610_s3 + $0x10] sm:$0xff] }
  0x1a   :  { %85 = vmatpush.msra.mxu0 %v34_v32  ;;  %141 = vmatpush.msra.mxu2 %v122_v34  ;;  %v118_v46 = vld [vmem:[%s610_s3 + $0x20] sm:$0xff]  ;;  %v115_v49 = vld [vmem:[%s610_s3 + $0x8] sm:$0xff]  ;;  %v170_v51 = vld [vmem:[%s612_s5 + $0x78] sm:$0xff] }
  0x1b   :  { %105 = vmatpush.msra.mxu1 %v50_v33  ;;  %v114_v50 = vld [vmem:[%s610_s3] sm:$0xff]  ;;  %v169_v52 = vld [vmem:[%s612_s5 + $0x70] sm:$0xff]  ;;  %175 = vmatpush.msra.mxu3 %v170_v51  ;;  %v168_v53 = vld [vmem:[%s612_s5 + $0x68] sm:$0xff] }
  0x1c   :  { %86 = vmatpush.msra.mxu0 %v33_v35  ;;  %142 = vmatpush.msra.mxu2 %v121_v37  ;;  %v167_v54 = vld [vmem:[%s612_s5 + $0x60] sm:$0xff]  ;;  %v166_v55 = vld [vmem:[%s612_s5 + $0x58] sm:$0xff]  ;;  %v165_v56 = vld [vmem:[%s612_s5 + $0x50] sm:$0xff] }
  0x1d   :  { %106 = vmatpush.msra.mxu1 %v49_v36  ;;  %176 = vmatpush.msra.mxu3 %v169_v52  ;;  %v164_v57 = vld [vmem:[%s612_s5 + $0x48] sm:$0xff]  ;;  %v163_v58 = vld [vmem:[%s612_s5 + $0x40] sm:$0xff]  ;;  %v162_v59 = vld [vmem:[%s612_s5 + $0x38] sm:$0xff] }
  0x1e   :  { %87 = vmatpush.msra.mxu0 %v32_v38  ;;  %143 = vmatpush.msra.mxu2 %v120_v40  ;;  %v161_v60 = vld [vmem:[%s612_s5 + $0x30] sm:$0xff]  ;;  %v160_v61 = vld [vmem:[%s612_s5 + $0x28] sm:$0xff]  ;;  %v159_v62 = vld [vmem:[%s612_s5 + $0x20] sm:$0xff] }
  0x1f   :  { %107 = vmatpush.msra.mxu1 %v48_v39  ;;  %177 = vmatpush.msra.mxu3 %v168_v53  ;;  %v273_v63 = vld [vmem:[%s609_s2] ss:$0 sm:$0xff]  ;;  %v158_v0 = vld [vmem:[%s612_s5 + $0x18] sm:$0xff]  ;;  %v157_v6 = vld [vmem:[%s612_s5 + $0x10] sm:$0xff] }
  0x20   :  { %88 = vmatpush.msra.mxu0 %v31_v41  ;;  %144 = vmatpush.msra.mxu2 %v119_v45  ;;  %v156_v7 = vld [vmem:[%s612_s5 + $0x8] sm:$0xff]  ;;  %v155_v8 = vld [vmem:[%s612_s5] sm:$0xff]  ;;  %v217_v13 = vld [vmem:[%s614_s7 + $0x78] sm:$0xff] }
  0x21   :  { %108 = vmatpush.msra.mxu1 %v47_v42  ;;  %89 = vmatmul.f32.vlgmr.msra.gmra.mxu0 %v69_v43  ;;  %v274_v9 = vld [vmem:[%s611_s4] ss:$0 sm:$0xff]  ;;  %v216_v14 = vld [vmem:[%s614_s7 + $0x70] sm:$0xff]  ;;  %v215_v15 = vld [vmem:[%s614_s7 + $0x68] sm:$0xff] }
  0x22   :  { %109 = vmatmul.f32.vlgmr.msra.gmra.mxu1 %v70_v44  ;;  %145 = vmatpush.msra.mxu2 %v118_v46  ;;  %v214_v16 = vld [vmem:[%s614_s7 + $0x60] sm:$0xff]  ;;  %v213_v17 = vld [vmem:[%s614_s7 + $0x58] sm:$0xff]  ;;  %v212_v18 = vld [vmem:[%s614_s7 + $0x50] sm:$0xff] }
  0x23   :  { %178 = vmatpush.msra.mxu3 %v167_v54  ;;  %218 = vmatpush.msrb.mxu0 %v217_v13  ;;  %v211_v19 = vld [vmem:[%s614_s7 + $0x48] sm:$0xff]  ;;  %v210_v20 = vld [vmem:[%s614_s7 + $0x40] sm:$0xff]  ;;  %v209_v21 = vld [vmem:[%s614_s7 + $0x38] sm:$0xff] }
  0x24   :  { %146 = vmatpush.msra.mxu2 %v117_v47  ;;  %v208_v22 = vld [vmem:[%s614_s7 + $0x30] sm:$0xff]  ;;  %v275_v23 = vld [vmem:[%s613_s6] ss:$0 sm:$0xff]  ;;  %v207_v27 = vld [vmem:[%s614_s7 + $0x28] sm:$0xff] }
  0x25   :  { %179 = vmatpush.msra.mxu3 %v166_v55  ;;  %219 = vmatpush.msrb.mxu0 %v216_v14  ;;  %v206_v28 = vld [vmem:[%s614_s7 + $0x20] sm:$0xff]  ;;  %v205_v29 = vld [vmem:[%s614_s7 + $0x18] sm:$0xff]  ;;  %v204_v30 = vld [vmem:[%s614_s7 + $0x10] sm:$0xff] }
  0x26   :  { %147 = vmatpush.msra.mxu2 %v116_v48  ;;  %v203_v31 = vld [vmem:[%s614_s7 + $0x8] sm:$0xff]  ;;  %v202_v32 = vld [vmem:[%s614_s7] sm:$0xff]  ;;  %s306_s7 = smov [#allocation2]  }
  0x27   :  { %180 = vmatpush.msra.mxu3 %v165_v56  ;;  %220 = vmatpush.msrb.mxu0 %v215_v15  ;;  %s261_s5 = sshll.u32 %s306_s7, 4  ;;  %s262_s5 = int_to_ptr.vmem [resolvable:$true] %s261_s5 }
  0x28   :  { %148 = vmatpush.msra.mxu2 %v115_v49 }
  0x29   :  { %181 = vmatpush.msra.mxu3 %v164_v57  ;;  %221 = vmatpush.msrb.mxu0 %v214_v16 }
  0x2a   :  { %149 = vmatpush.msra.mxu2 %v114_v50 }
  0x2b   :  { %182 = vmatpush.msra.mxu3 %v163_v58  ;;  %222 = vmatpush.msrb.mxu0 %v213_v17 }
  0x2d   :  { %183 = vmatpush.msra.mxu3 %v162_v59  ;;  %223 = vmatpush.msrb.mxu0 %v212_v18 }
  0x2f   :  { %184 = vmatpush.msra.mxu3 %v161_v60  ;;  %224 = vmatpush.msrb.mxu0 %v211_v19 }
  0x31   :  { %185 = vmatpush.msra.mxu3 %v160_v61  ;;  %225 = vmatpush.msrb.mxu0 %v210_v20 }
  0x33   :  { %186 = vmatpush.msra.mxu3 %v159_v62  ;;  %226 = vmatpush.msrb.mxu0 %v209_v21 }
  0x35   :  { %187 = vmatpush.msra.mxu3 %v158_v0  ;;  %227 = vmatpush.msrb.mxu0 %v208_v22 }
  0x37   :  { %188 = vmatpush.msra.mxu3 %v157_v6  ;;  %228 = vmatpush.msrb.mxu0 %v207_v27 }
  0x39   :  { %189 = vmatpush.msra.mxu3 %v156_v7  ;;  %229 = vmatpush.msrb.mxu0 %v206_v28 }
  0x3b   :  { %190 = vmatpush.msra.mxu3 %v155_v8  ;;  %230 = vmatpush.msrb.mxu0 %v205_v29 }
  0x3d   :  { %231 = vmatpush.msrb.mxu0 %v204_v30 }
  0x3f   :  { %232 = vmatpush.msrb.mxu0 %v203_v31 }
  0x41   :  { %233 = vmatpush.msrb.mxu0 %v202_v32 }
  0x9e   :  { %v90_v1 = vpop.f32.mrf.mxu0 }
  0x9f   :  { %v110_v2 = vpop.f32.mrf.mxu1  ;;  %v91_v3 = vadd.f32 %v273_v63, %v90_v1 }
  0xa1   :  { %v111_v4 = vadd.f32 %v110_v2, %v91_v3 }
  0xa3   :  { %v113_v5 = vmax.f32 %v111_v4, 0.0 }
  0xa5   :  { %150 = vmatmul.f32.vlgmr.msra.gmra.mxu2 %v113_v5 }
 0x128   :  { %v151_v10 = vpop.f32.mrf.mxu2 }
 0x129   :  { %v152_v11 = vadd.f32 %v274_v9, %v151_v10 }
 0x12b   :  { %v154_v12 = vmax.f32 %v152_v11, 0.0 }
 0x12d   :  { %191 = vmatmul.f32.vlgmr.msra.gmra.mxu3 %v154_v12 }
 0x1b0   :  { %v192_v24 = vpop.f32.mrf.mxu3 }
 0x1b1   :  { %v193_v25 = vadd.f32 %v275_v23, %v192_v24 }
 0x1b3   :  { %v196_v26 = vsel %vm195_vm0, %v193_v25, -inf }
 0x1b4   :  { %197 = vmax.xlane.f32.xlu0 %v196_v26 }
 0x227   :  { %v198_v33 = vpop.xlane.xlu0 %197 }
 0x228   :  { %v199_v34 = vsub.f32 %v193_v25, %v198_v33 }
 0x22a   :  { %v200_v35 = vmul.f32 1.442695, %v199_v34 }
 0x22c   :  { %276 = vpow2.f32 %v200_v35 }
 0x232   :  { %v277_v36 = vpop.eup %276 }
 0x233   :  { %234 = vmatmul.f32.vlgmr.msrb.gmra.mxu0 %v277_v36 }
 0x2b0   :  { %v235_v37 = vpop.f32.mrf.mxu0 }
 0x2b1   :  { %vm238_vm1 = vcmp.gt.f32.partialorder %v235_v37, 0.0 }
 0x2b2   :  { %v239_v38 = vsel %vm238_vm1, %v235_v37, 1.0 }
 0x2b3   :  { %278 = vrcp.f32 %v239_v38  ;;  %v251_v42 = vand.u32 2147483648, %v239_v38  ;;  %v249_v44 = vand.u32 2147483647, %v239_v38  ;;  %vm245_vm3 = vweird.f32 %v239_v38 }
 0x2b5   :  { %v252_v46 = vor.u32 1.1754944e-38, %v251_v42  ;;  %vm250_vm5 = vcmp.eq.f32.partialorder %v249_v44, 8.507059e+37 }
 0x2b9   :  { %v279_v39 = vpop.eup %278 }
 0x2ba   :  { %v241_v40 = vmul.f32 %v279_v39, %v239_v38  ;;  %vm246_vm2 = vweird.f32 %v279_v39 }
 0x2bb   :  { %vm247_vm4 = vmor %vm245_vm3, %vm246_vm2 }
 0x2bc   :  { %v242_v41 = vsub.f32 1.0, %v241_v40 }
 0x2be   :  { %v243_v43 = vmul.f32 %v279_v39, %v242_v41 }
 0x2c0   :  { %v244_v45 = vadd.f32 %v279_v39, %v243_v43 }
 0x2c2   :  { %v248_v47 = vsel %vm247_vm4, %v279_v39, %v244_v45 }
 0x2c3   :  { %v253_v48 = vsel %vm250_vm5, %v252_v46, %v248_v47 }
 0x2c4   :  { %v254_v49 = vmul.f32 %v277_v36, %v253_v48 }
 0x2c6   :  { %255 = vst [vmem:[#allocation2] sm:$0x3] %v254_v49 }
 0x2c7   :  { %266 = dma.vmem_to_hbm [thread:$0]  %s262_s5, 32, %s264_s25, [#allocation3]  }
 0x2c8   :  { %304 = dma.done.wait [#allocation3], 32  }
 0x2c9   :  { %305 = vsyncadd [#allocation3], 4294967264 }
 0x2ca   :  { %271 = vsyncpa [#allocation3], 1 }

</bundles_post_ra>
